<compile_context>
chip_gen: v6e
topology: v6e:2x2x1
jax: 0.10.0
libtpu: 0.0.40
codegen_flags: <defaults>
</compile_context>

<pallas_src>
import itertools
from functools import partial

import jax
import jax.numpy as jnp
import numpy as np
from jax import lax
from jax.experimental import pallas as pl
from jax.experimental.pallas import tpu as pltpu

DEGREE = 3
INP_SIZE = 4
OUT_SIZE = 32
MAX_TB = 4096     # max packed-row batch tile per grid step (VMEM ~5 MiB at 4096, safe on v5e/v6e/v7x)
SUB_BLOCK = 64    # in-kernel row sub-block: keeps intermediates (<=64x512 f32) near the vreg budget


def _round_up(x, m):
    return ((x + m - 1) // m) * m


def _ceil128(n):
    return _round_up(n, 128)


def ordered_tuples(n, d):
    # lexicographic enumeration of ordered (non-decreasing) tuples, same order as
    # iter_ordered_tuples(0, n, d) in the torch module.
    return list(itertools.combinations_with_replacement(range(n), d))


def build_selection_matrices(inp_size, degree):
    """One-hot matrices turning the recursive monomial gathers into matmuls."""
    sels = []
    for d in range(2, degree + 1):
        prev_idx = {t: i for i, t in enumerate(ordered_tuples(inp_size, d - 1))}
        cur = ordered_tuples(inp_size, d)
        sel_var = np.zeros((inp_size, len(cur)), np.float32)       # picks x[:, t[0]]
        sel_sub = np.zeros((len(prev_idx), len(cur)), np.float32)  # picks m_{d-1}[:, idx(t[1:])]
        for n_, t in enumerate(cur):
            sel_var[t[0], n_] = 1.0
            sel_sub[prev_idx[t[1:]], n_] = 1.0
        sels.append((sel_var, sel_sub))
    return sels


def segment_widths(degree, inp_size, out_size, pack):
    """Static per-stage lane widths of the fused RHS matrices (all 128-aligned)."""
    C = [len(ordered_tuples(inp_size, d)) for d in range(degree + 1)]
    out_w = pack * out_size
    padC = {d: _ceil128(pack * C[d]) for d in range(2, degree + 1)}
    stages = []
    w0 = [out_w]                                   # W1
    if degree >= 2:
        w0.append(padC[2])                         # SS2 (sub-monomial gather, degree 2)
        w0 += [padC[d] for d in range(2, degree + 1)]   # SV_d (variable gather), d = 2..D
    stages.append(tuple(w0))
    for d in range(2, degree + 1):
        if d < degree:
            stages.append((padC[d + 1], out_w))    # [SS_{d+1} | W_d]
        else:
            stages.append((out_w,))                # [W_D]
    return tuple(stages)


def prepare_packed_params(coeffs, degree, inp_size, out_size, pack):
    """Build lane-packed, segment-fused constants ONCE (outside the forward path).

    coeffs[d] has shape (out_size, C_d), matching torch's coeff_deg_d.
    Returns (rhs_stages, bias): rhs_stages[0] is the RHS for the x-LHS fused matmul,
    rhs_stages[s] (s>=1) is the RHS for the degree-(s+1) monomial LHS.  `pack` samples
    are packed along lanes via block-diagonal (kron with I_pack) copies.
    """
    assert (pack * out_size) % 128 == 0, "output lane packing must be 128-aligned"
    eye = np.eye(pack, dtype=np.float32)
    C = [len(ordered_tuples(inp_size, d)) for d in range(degree + 1)]
    out_w = pack * out_size
    padC = {d: _ceil128(pack * C[d]) for d in range(2, degree + 1)}

    W = {d: np.kron(eye, np.asarray(coeffs[d], np.float32).T) for d in range(1, degree + 1)}
    sels = build_selection_matrices(inp_size, degree)
    SV = {d: np.kron(eye, sels[d - 2][0]) for d in range(2, degree + 1)}
    SS = {d: np.kron(eye, sels[d - 2][1]) for d in range(2, degree + 1)}

    kx = pack * inp_size

    def padded(a, rows, cols):
        return np.pad(a, ((0, rows - a.shape[0]), (0, cols - a.shape[1])))

    stage0 = [padded(W[1], kx, out_w)]
    if degree >= 2:
        stage0.append(padded(SS[2], kx, padC[2]))
        stage0 += [padded(SV[d], kx, padC[d]) for d in range(2, degree + 1)]
    rhs = [np.concatenate(stage0, axis=1)]
    for d in range(2, degree + 1):
        k = padC[d]
        if d < degree:
            rhs.append(np.concatenate(
                [padded(SS[d + 1], k, padC[d + 1]), padded(W[d], k, out_w)], axis=1))
        else:
            rhs.append(padded(W[d], k, out_w))
    bias = np.tile(np.asarray(coeffs[0], np.float32).T, (1, pack))   # (1, pack*out)
    return tuple(jnp.asarray(r) for r in rhs), jnp.asarray(bias)


def poly_kernel(seg_widths, sub_block, *refs):
    # refs = (x, rhs_stage_0, ..., rhs_stage_{D-1}, bias, out)
    n_stage = len(seg_widths)
    x_ref = refs[0]
    rhs_refs = refs[1:1 + n_stage]
    b_ref = refs[1 + n_stage]
    o_ref = refs[-1]
    n_sb = x_ref.shape[0] // sub_block   # static

    def body(sb, carry):
        r0 = pl.multiple_of(sb * sub_block, sub_block)
        x = x_ref[pl.ds(r0, sub_block), :]                               # (SB, pack*inp)
        # Fused x-LHS matmul: [W1 | SS2 | SV2 | ... | SVD], 128-aligned segments.
        y0 = jnp.dot(x, rhs_refs[0][...], preferred_element_type=jnp.float32)
        w0 = seg_widths[0]
        acc = y0[:, :w0[0]]                                              # x @ W1
        if n_stage > 1:
            sub = y0[:, w0[0]:w0[0] + w0[1]]                             # m1 gathered for deg-2
            var_offs = []
            off = w0[0] + w0[1]
            for wseg in w0[2:]:
                var_offs.append((off, wseg))
                off += wseg
            for s in range(1, n_stage):                                  # degree d = s + 1
                vo, vw = var_offs[s - 1]
                m = y0[:, vo:vo + vw] * sub                              # degree-(s+1) monomials (lane-padded)
                ys = jnp.dot(m, rhs_refs[s][...], preferred_element_type=jnp.float32)
                ws = seg_widths[s]
                if len(ws) == 2:                                         # [SS_{d+1} | W_d]
                    sub = ys[:, :ws[0]]
                    acc = acc + ys[:, ws[0]:ws[0] + ws[1]]
                else:                                                    # [W_D]
                    acc = acc + ys
        o_ref[pl.ds(r0, sub_block), :] = acc + b_ref[...]                # bias fused into store
        return carry

    lax.fori_loop(0, n_sb, body, 0)


@partial(jax.jit, static_argnames=("degree", "inp_size", "out_size", "pack", "max_tb", "sub_block"))
def polynomial_layer_forward(x, packed_params, *, degree, inp_size, out_size, pack,
                             max_tb=MAX_TB, sub_block=SUB_BLOCK):
    rhs, bias = packed_params

    x2 = jnp.reshape(x, (-1, inp_size)).astype(jnp.float32)     # inp.view(-1, inp_size)
    batch = x2.shape[0]

    # Pack `pack` samples per 128-lane row (copy-free when batch is already aligned).
    pad_s = (-batch) % pack
    if pad_s:                                                    # static check
        x2 = jnp.pad(x2, ((0, pad_s), (0, 0)))
    rows = x2.shape[0] // pack
    xpk = jnp.reshape(x2, (rows, pack * inp_size))               # free row-major reshape

    # Tile/grid selection: minimize padding, keep >=2 blocks when rows permit (v7x 2 TCs),
    # cap the tile at max_tb packed rows, and keep tb a multiple of the in-kernel sub-block.
    min_grid = 2 if rows > sub_block else 1
    grid = max(-(-rows // max_tb), min_grid)
    tb = _round_up(-(-rows // grid), sub_block)
    grid = -(-rows // tb)
    R = grid * tb
    if R != rows:                                                # static check
        xpk = jnp.pad(xpk, ((0, R - rows), (0, 0)))

    out_w = pack * out_size
    seg_w = segment_widths(degree, inp_size, out_size, pack)

    inputs = [xpk]
    in_specs = [pl.BlockSpec((tb, pack * inp_size), lambda i: (i, 0))]
    for r in rhs:                                                # fused constants: full blocks
        inputs.append(r)
        in_specs.append(pl.BlockSpec(r.shape, lambda i: (0, 0)))
    inputs.append(bias)
    in_specs.append(pl.BlockSpec(bias.shape, lambda i: (0, 0)))

    out = pl.pallas_call(
        partial(poly_kernel, seg_w, sub_block),
        out_shape=jax.ShapeDtypeStruct((R, out_w), jnp.float32),
        grid=(grid,),
        in_specs=in_specs,
        out_specs=pl.BlockSpec((tb, out_w), lambda i: (i, 0)),
        compiler_params=pltpu.CompilerParams(dimension_semantics=("parallel",)),
    )(*inputs)

    # Unpack lanes back to one sample per row; slices only when padding actually happened.
    if R != rows:                                                # static check
        out = out[:rows]
    out = out.reshape(rows * pack, out_size)
    if rows * pack != batch:                                     # static check
        out = out[:batch]
    return out


def reference_forward(x, coeffs, degree, inp_size):
    xn = np.asarray(x, dtype=np.float32).reshape(-1, inp_size)
    out = np.tile(np.asarray(coeffs[0], dtype=np.float32).T, (xn.shape[0], 1))
    for d in range(1, degree + 1):
        M = np.stack([np.prod(xn[:, list(t)], axis=1)
                      for t in ordered_tuples(inp_size, d)], axis=1)
        out = out + M @ np.asarray(coeffs[d], dtype=np.float32).T
    return out


if __name__ == "__main__":
    key = jax.random.PRNGKey(0)
    keys = jax.random.split(key, DEGREE + 4)

    # deterministic "kaiming_uniform_(a=sqrt(5))" init: U(-1/sqrt(fan_in), 1/sqrt(fan_in))
    coeffs = []
    for d in range(DEGREE + 1):
        c_d = len(ordered_tuples(INP_SIZE, d))      # count_ordered_tuples(0, d); d=0 -> 1
        bound = 1.0 / np.sqrt(max(c_d, 1))
        coeffs.append(jax.random.uniform(keys[d + 1], (OUT_SIZE, c_d),
                                         jnp.float32, -bound, bound))

    PACK = max(1, 128 // OUT_SIZE)                  # 4 samples per 128-lane row
    params = prepare_packed_params(coeffs, DEGREE, INP_SIZE, OUT_SIZE, PACK)
    run = partial(polynomial_layer_forward, degree=DEGREE, inp_size=INP_SIZE,
                  out_size=OUT_SIZE, pack=PACK)

    # --- small correctness check (same shape family as the torch module demo; grid=1) ---
    x = jax.random.normal(keys[0], (2, 4, INP_SIZE), jnp.float32)   # view(-1, 4) -> 8 samples
    out = jax.block_until_ready(run(x, params))
    ref = reference_forward(x, coeffs, DEGREE, INP_SIZE)
    np.testing.assert_allclose(np.asarray(out), ref, rtol=2e-3, atol=2e-3)

    # --- unaligned batch: exercises sample padding, grid=2 (both TCs on v7x), output slice ---
    x_big = jax.random.normal(keys[-2], (4094, INP_SIZE), jnp.float32)
    out_big = jax.block_until_ready(run(x_big, params))
    np.testing.assert_allclose(np.asarray(out_big),
                               reference_forward(x_big, coeffs, DEGREE, INP_SIZE),
                               rtol=2e-3, atol=5e-3)

    # --- aligned batch: fully copy-free wrapper path (no pads, no slices), grid=2 ---
    x_al = jax.random.normal(keys[-1], (2048, INP_SIZE), jnp.float32)
    out_al = jax.block_until_ready(run(x_al, params))
    np.testing.assert_allclose(np.asarray(out_al),
                               reference_forward(x_al, coeffs, DEGREE, INP_SIZE),
                               rtol=2e-3, atol=5e-3)

    # TODO(synk): training utilities (fit_to_training / norm_coefficients) are host-side
    # optimizer loops, out of scope for the forward-pass kernel.
    print("KERNEL_OK")
</pallas_src>

<mosaic_0001>
module attributes {stable_mosaic.version = 11 : i64} {
  func.func @poly_kernel(%arg0: i32, %arg1: memref<64x16xf32, #tpu.memory_space<vmem>>, %arg2: memref<16x512xf32, #tpu.memory_space<vmem>>, %arg3: memref<128x256xf32, #tpu.memory_space<vmem>>, %arg4: memref<128x128xf32, #tpu.memory_space<vmem>>, %arg5: memref<1x128xf32, #tpu.memory_space<vmem>>, %arg6: memref<64x128xf32, #tpu.memory_space<vmem>>) attributes {dimension_semantics = [#tpu.dimension_semantics<parallel>], iteration_bounds = array<i64: 1>, scalar_prefetch = 0 : i64, scratch_operands = 0 : i64, tpu.core_type = #tpu.core_type<tc>, window_params = [{transform_indices = @transform_0, window_bounds = array<i64: 64, 16>}, {pipeline_mode = #tpu.pipeline_mode<synchronous>, transform_indices = @transform_1, window_bounds = array<i64: 16, 512>}, {pipeline_mode = #tpu.pipeline_mode<synchronous>, transform_indices = @transform_2, window_bounds = array<i64: 128, 256>}, {pipeline_mode = #tpu.pipeline_mode<synchronous>, transform_indices = @transform_3, window_bounds = array<i64: 128, 128>}, {pipeline_mode = #tpu.pipeline_mode<synchronous>, transform_indices = @transform_4, window_bounds = array<i64: 1, 128>}, {transform_indices = @transform_5, window_bounds = array<i64: 64, 128>}]} {
    %c0_i32 = arith.constant 0 : i32
    %c64_i32 = arith.constant 64 : i32
    %0 = arith.muli %c0_i32, %c64_i32 : i32
    %1 = tpu.assume_multiple %0, 64 : i32
    %2 = arith.index_cast %1 : i32 to index
    %c0 = arith.constant 0 : index
    %3 = vector.load %arg1[%2, %c0] : memref<64x16xf32, #tpu.memory_space<vmem>>, vector<64x16xf32>
    %c0_0 = arith.constant 0 : index
    %c0_1 = arith.constant 0 : index
    %4 = vector.load %arg2[%c0_0, %c0_1] : memref<16x512xf32, #tpu.memory_space<vmem>>, vector<16x512xf32>
    %cst = arith.constant dense<0.000000e+00> : vector<64x512xf32>
    %5 = tpu.matmul %3, %4, %cst {dimension_numbers = #tpu.dot_dimension_numbers<[1], [0], [0], [1], [0, 0, 1, 1], [], []>} : vector<64x16xf32>, vector<16x512xf32>, vector<64x512xf32> -> vector<64x512xf32>
    %6 = vector.extract_strided_slice %5 {offsets = [0, 0], sizes = [64, 128], strides = [1, 1]} : vector<64x512xf32> to vector<64x128xf32>
    %7 = vector.extract_strided_slice %5 {offsets = [0, 128], sizes = [64, 128], strides = [1, 1]} : vector<64x512xf32> to vector<64x128xf32>
    %8 = vector.extract_strided_slice %5 {offsets = [0, 256], sizes = [64, 128], strides = [1, 1]} : vector<64x512xf32> to vector<64x128xf32>
    %9 = arith.mulf %8, %7 : vector<64x128xf32>
    %c0_2 = arith.constant 0 : index
    %c0_3 = arith.constant 0 : index
    %10 = vector.load %arg3[%c0_2, %c0_3] : memref<128x256xf32, #tpu.memory_space<vmem>>, vector<128x256xf32>
    %cst_4 = arith.constant dense<0.000000e+00> : vector<64x256xf32>
    %11 = tpu.matmul %9, %10, %cst_4 {dimension_numbers = #tpu.dot_dimension_numbers<[1], [0], [0], [1], [0, 0, 1, 1], [], []>} : vector<64x128xf32>, vector<128x256xf32>, vector<64x256xf32> -> vector<64x256xf32>
    %12 = vector.extract_strided_slice %11 {offsets = [0, 0], sizes = [64, 128], strides = [1, 1]} : vector<64x256xf32> to vector<64x128xf32>
    %13 = vector.extract_strided_slice %11 {offsets = [0, 128], sizes = [64, 128], strides = [1, 1]} : vector<64x256xf32> to vector<64x128xf32>
    %14 = arith.addf %6, %13 : vector<64x128xf32>
    %15 = vector.extract_strided_slice %5 {offsets = [0, 384], sizes = [64, 128], strides = [1, 1]} : vector<64x512xf32> to vector<64x128xf32>
    %16 = arith.mulf %15, %12 : vector<64x128xf32>
    %c0_5 = arith.constant 0 : index
    %c0_6 = arith.constant 0 : index
    %17 = vector.load %arg4[%c0_5, %c0_6] : memref<128x128xf32, #tpu.memory_space<vmem>>, vector<128x128xf32>
    %cst_7 = arith.constant dense<0.000000e+00> : vector<64x128xf32>
    %18 = tpu.matmul %16, %17, %cst_7 {dimension_numbers = #tpu.dot_dimension_numbers<[1], [0], [0], [1], [0, 0, 1, 1], [], []>} : vector<64x128xf32>, vector<128x128xf32>, vector<64x128xf32> -> vector<64x128xf32>
    %19 = arith.addf %14, %18 : vector<64x128xf32>
    %c0_8 = arith.constant 0 : index
    %c0_9 = arith.constant 0 : index
    %20 = vector.load %arg5[%c0_8, %c0_9] : memref<1x128xf32, #tpu.memory_space<vmem>>, vector<1x128xf32>
    %21 = vector.broadcast %20 : vector<1x128xf32> to vector<64x128xf32>
    %22 = arith.addf %19, %21 : vector<64x128xf32>
    %23 = arith.index_cast %1 : i32 to index
    %c0_10 = arith.constant 0 : index
    %24 = vector.load %arg6[%23, %c0_10] : memref<64x128xf32, #tpu.memory_space<vmem>>, vector<64x128xf32>
    tpu.vector_store %arg6[%23, %c0_10], %22 {strides = array<i32>} : memref<64x128xf32, #tpu.memory_space<vmem>>, vector<64x128xf32>,
    %c1_i32 = arith.constant 1 : i32
    return
  }
  func.func @transform_0(%arg0: i32) -> (i32, i32) {
    %c0_i32 = arith.constant 0 : i32
    %c0_i32_0 = arith.constant 0 : i32
    return %arg0, %c0_i32 : i32, i32
  }
  func.func @transform_1(%arg0: i32) -> (i32, i32) {
    %c0_i32 = arith.constant 0 : i32
    %c0_i32_0 = arith.constant 0 : i32
    %c0_i32_1 = arith.constant 0 : i32
    return %c0_i32, %c0_i32_0 : i32, i32
  }
  func.func @transform_2(%arg0: i32) -> (i32, i32) {
    %c0_i32 = arith.constant 0 : i32
    %c0_i32_0 = arith.constant 0 : i32
    %c0_i32_1 = arith.constant 0 : i32
    return %c0_i32, %c0_i32_0 : i32, i32
  }
  func.func @transform_3(%arg0: i32) -> (i32, i32) {
    %c0_i32 = arith.constant 0 : i32
    %c0_i32_0 = arith.constant 0 : i32
    %c0_i32_1 = arith.constant 0 : i32
    return %c0_i32, %c0_i32_0 : i32, i32
  }
  func.func @transform_4(%arg0: i32) -> (i32, i32) {
    %c0_i32 = arith.constant 0 : i32
    %c0_i32_0 = arith.constant 0 : i32
    %c0_i32_1 = arith.constant 0 : i32
    return %c0_i32, %c0_i32_0 : i32, i32
  }
  func.func @transform_5(%arg0: i32) -> (i32, i32) {
    %c0_i32 = arith.constant 0 : i32
    %c0_i32_0 = arith.constant 0 : i32
    return %arg0, %c0_i32 : i32, i32
  }
}

</mosaic_0001>

<bundles_post_ra>
// kernel: polynomial_layer_forward.1
= control target key start
LH: loop header
LB: loop body
LE: loop exit
PB: predicated region body
PF: predicated region fallthrough
CT: control target
= control target key end

     0   :  { %10 = vsyncpa [#allocation3], 0  ;;  %s960_s0 = inlined_call_operand.vmem [shape: f32[64,16], index: 0, kind: input, shape index: {}]   ;;  %s961_s1 = inlined_call_operand.vmem [shape: f32[16,512], index: 1, kind: input, shape index: {}]   ;;  %s962_s2 = inlined_call_operand.hbm [shape: f32[128,256], index: 2, kind: input, shape index: {}]   ;;  %s963_s3 = inlined_call_operand.hbm [shape: f32[128,128], index: 3, kind: input, shape index: {}]   ;;  %s964_s4 = inlined_call_operand.vmem [shape: f32[1,128], index: 4, kind: input, shape index: {}]   ;;  %s965_s5 = inlined_call_operand.vmem [shape: f32[64,128], index: 5, kind: output, shape index: {}]  }
   0x1   :  { %11 = vsyncpa [#allocation5], 0  ;;  %s778_s18 = smov [#allocation2]  }
   0x2   :  { %s21_s19 = sshll.u32 %s778_s18, 4  ;;  %s22_s19 = int_to_ptr.vmem [resolvable:$true] %s21_s19 }
   0x3   :  { %s742_s20 = scalar_lea.vmem %s22_s19, 4096  ;;  %p747_p1 = scmp.lt.s32.totalorder %s22_s19, %s22_s19 }
   0x4   :  { %p743_p0 = scmp.ne.s32.totalorder %s22_s19, %s742_s20  ;;  %p748_p2 = scmp.lt.s32.totalorder %s742_s20, %s742_s20 }
   0x6   :  { %p749_p3 = por %p748_p2, %p747_p1 }
   0x8   :  { %p750_p4 = pnand %p749_p3, %p743_p0 }
   0xa   :  { %753 = shalt.err (!%p750_p4)
}
   0xb   :  { %s779_s21 = smov 256   ;;  %s780_s22 = smov 16  }
   0xc   :  { %27 = dma.hbm_to_vmem [thread:$0]  %s962_s2, 4096, %s22_s19, [#allocation3], %s779_s21, %s779_s21, %s780_s22  }
   0xd   :  { %s781_s25 = smov [#allocation4]  }
   0xe   :  { %s33_s26 = sshll.u32 %s781_s25, 4  ;;  %s34_s26 = int_to_ptr.vmem [resolvable:$true] %s33_s26 }
   0xf   :  { %s762_s27 = scalar_lea.vmem %s34_s26, 2048  ;;  %p767_p6 = scmp.lt.s32.totalorder %s34_s26, %s34_s26 }
  0x10   :  { %p763_p5 = scmp.ne.s32.totalorder %s34_s26, %s762_s27  ;;  %p768_p7 = scmp.lt.s32.totalorder %s762_s27, %s762_s27 }
  0x12   :  { %p769_p8 = por %p768_p7, %p767_p6 }
  0x14   :  { %p770_p9 = pnand %p769_p8, %p763_p5 }
  0x16   :  { %773 = shalt.err (!%p770_p9)
}
  0x17   :  { %s782_s28 = smov 128   ;;  %s783_s29 = smov 8  }
  0x18   :  { %39 = dma.hbm_to_vmem [thread:$0]  %s963_s3, 2048, %s34_s26, [#allocation5], %s782_s28, %s782_s28, %s783_s29  }
  0x19   :  { %774 = dma.done.wait [#allocation3], 4096  }
  0x1a   :  { %775 = vsyncadd [#allocation3], 4294963200 }
  0x1b   :  { %776 = dma.done.wait [#allocation5], 2048  }
  0x1c   :  { %777 = vsyncadd [#allocation5], 4294965248  ;;  %v784_v0 = vmov 0.0   ;;  %v61_v1 = vld [vmem:[%s961_s1 + $0x28] sm:$0xff]  ;;  %v63_v2 = vld [vmem:[%s961_s1 + $0x38] sm:$0xff]  ;;  %vm64_vm0 = vcmask 130048  }
  0x1d   :  { %153 = vmatprep.mubr.f32.mxu0 %v784_v0  ;;  %266 = vmatprep.mubr.f32.mxu1 %v784_v0  ;;  %v60_v3 = vld [vmem:[%s961_s1 + $0x20] sm:$0xff]  ;;  %v62_v4 = vld [vmem:[%s961_s1 + $0x30] sm:$0xff]  ;;  %v57_v5 = vld [vmem:[%s961_s1 + $0x8] sm:$0xff] }
  0x1e   :  { %117 = vmatprep.subr.mxu0 %v61_v1  ;;  %230 = vmatprep.subr.mxu1 %v63_v2  ;;  %v59_v6 = vld [vmem:[%s961_s1 + $0x18] sm:$0xff]  ;;  %v56_v7 = vld [vmem:[%s961_s1] sm:$0xff]  ;;  %v58_v8 = vld [vmem:[%s961_s1 + $0x10] sm:$0xff] }
  0x1f   :  { %118 = vmatpush1.msra.mxu0 %v60_v3  ;;  %231 = vmatpush1.msra.mxu1 %v62_v4  ;;  %v48_v9 = vld [vmem:[%s960_s0] sm:$0xff]  ;;  %v354_v10 = vld [vmem:[#allocation2 + $0xf8] sm:$0xff]  ;;  %v353_v11 = vld [vmem:[#allocation2 + $0xf0] sm:$0xff] }
  0x20   :  { %119 = vmatprep.subr.mxu0 %v57_v5  ;;  %232 = vmatprep.subr.mxu1 %v59_v6  ;;  %v49_v12 = vld [vmem:[%s960_s0 + $0x8] sm:$0xff]  ;;  %v351_v14 = vld [vmem:[#allocation2 + $0xe0] sm:$0xff]  ;;  %v50_v15 = vld [vmem:[%s960_s0 + $0x10] sm:$0xff] }
  0x21   :  { %120 = vmatpush1.msra.mxu0 %v56_v7  ;;  %233 = vmatpush1.msra.mxu1 %v58_v8  ;;  %v352_v13 = vld [vmem:[#allocation2 + $0xe8] sm:$0xff]  ;;  %v350_v16 = vld [vmem:[#allocation2 + $0xd8] sm:$0xff]  ;;  %v349_v17 = vld [vmem:[#allocation2 + $0xd0] sm:$0xff] }
  0x22   :  { %642 = vmatmul.mubr.msk.f32.vlgmr.msra.gmra.mxu0 %vm64_vm0, %v48_v9  ;;  %650 = vmatmul.mubr.msk.f32.vlgmr.msra.gmra.mxu1 %vm64_vm0, %v48_v9  ;;  %v51_v18 = vld [vmem:[%s960_s0 + $0x18] sm:$0xff]  ;;  %v348_v19 = vld [vmem:[#allocation2 + $0xc8] sm:$0xff]  ;;  %v347_v20 = vld [vmem:[#allocation2 + $0xc0] sm:$0xff] }
  0x23   :  { %159 = vmatprep.mubr.f32.mxu0 %v784_v0  ;;  %272 = vmatprep.mubr.f32.mxu1 %v784_v0  ;;  %v52_v21 = vld [vmem:[%s960_s0 + $0x20] sm:$0xff]  ;;  %v346_v22 = vld [vmem:[#allocation2 + $0xb8] sm:$0xff]  ;;  %v345_v23 = vld [vmem:[#allocation2 + $0xb0] sm:$0xff] }
  0x24   :  { %355 = vmatprep.subr.mxu0 %v354_v10  ;;  %v53_v24 = vld [vmem:[%s960_s0 + $0x28] sm:$0xff]  ;;  %v343_v26 = vld [vmem:[#allocation2 + $0xa0] sm:$0xff]  ;;  %v54_v27 = vld [vmem:[%s960_s0 + $0x30] sm:$0xff] }
  0x25   :  { %356 = vmatpush1.msra.mxu0 %v353_v11  ;;  %v344_v25 = vld [vmem:[#allocation2 + $0xa8] sm:$0xff]  ;;  %v342_v28 = vld [vmem:[#allocation2 + $0x98] sm:$0xff]  ;;  %v341_v29 = vld [vmem:[#allocation2 + $0x90] sm:$0xff] }
  0x26   :  { %643 = vmatmul.mubr.msk.f32.gmra.mxu0 %vm64_vm0, %v49_v12  ;;  %651 = vmatmul.mubr.msk.f32.gmra.mxu1 %vm64_vm0, %v49_v12  ;;  %v55_v30 = vld [vmem:[%s960_s0 + $0x38] sm:$0xff]  ;;  %v340_v31 = vld [vmem:[#allocation2 + $0x88] sm:$0xff]  ;;  %v339_v32 = vld [vmem:[#allocation2 + $0x80] sm:$0xff] }
  0x27   :  { %165 = vmatprep.mubr.f32.mxu0 %v784_v0  ;;  %278 = vmatprep.mubr.f32.mxu1 %v784_v0  ;;  %v338_v33 = vld [vmem:[#allocation2 + $0x78] sm:$0xff]  ;;  %v337_v34 = vld [vmem:[#allocation2 + $0x70] sm:$0xff]  ;;  %v336_v35 = vld [vmem:[#allocation2 + $0x68] sm:$0xff] }
  0x28   :  { %357 = vmatprep.subr.mxu0 %v352_v13  ;;  %v335_v36 = vld [vmem:[#allocation2 + $0x60] sm:$0xff]  ;;  %v334_v37 = vld [vmem:[#allocation2 + $0x58] sm:$0xff]  ;;  %v333_v38 = vld [vmem:[#allocation2 + $0x50] sm:$0xff] }
  0x29   :  { %358 = vmatpush1.msra.mxu0 %v351_v14  ;;  %v332_v39 = vld [vmem:[#allocation2 + $0x48] sm:$0xff]  ;;  %v331_v40 = vld [vmem:[#allocation2 + $0x40] sm:$0xff]  ;;  %v330_v41 = vld [vmem:[#allocation2 + $0x38] sm:$0xff] }
  0x2a   :  { %644 = vmatmul.mubr.msk.f32.gmra.mxu0 %vm64_vm0, %v50_v15  ;;  %652 = vmatmul.mubr.msk.f32.gmra.mxu1 %vm64_vm0, %v50_v15  ;;  %v329_v42 = vld [vmem:[#allocation2 + $0x30] sm:$0xff]  ;;  %v328_v43 = vld [vmem:[#allocation2 + $0x28] sm:$0xff]  ;;  %v327_v44 = vld [vmem:[#allocation2 + $0x20] sm:$0xff] }
  0x2b   :  { %171 = vmatprep.mubr.f32.mxu0 %v784_v0  ;;  %284 = vmatprep.mubr.f32.mxu1 %v784_v0  ;;  %v326_v45 = vld [vmem:[#allocation2 + $0x18] sm:$0xff]  ;;  %v325_v46 = vld [vmem:[#allocation2 + $0x10] sm:$0xff]  ;;  %v324_v47 = vld [vmem:[#allocation2 + $0x8] sm:$0xff] }
  0x2c   :  { %359 = vmatprep.subr.mxu0 %v350_v16  ;;  %v323_v48 = vld [vmem:[#allocation2] sm:$0xff]  ;;  %v499_v49 = vld [vmem:[#allocation4 + $0x78] sm:$0xff]  ;;  %v498_v50 = vld [vmem:[#allocation4 + $0x70] sm:$0xff] }
  0x2d   :  { %360 = vmatpush1.msra.mxu0 %v349_v17  ;;  %683 = vmatprep.subr.mxu1 %v499_v49  ;;  %v497_v51 = vld [vmem:[#allocation4 + $0x68] sm:$0xff]  ;;  %v496_v52 = vld [vmem:[#allocation4 + $0x60] sm:$0xff]  ;;  %v495_v53 = vld [vmem:[#allocation4 + $0x58] sm:$0xff] }
  0x2e   :  { %645 = vmatmul.mubr.msk.f32.gmra.mxu0 %vm64_vm0, %v51_v18  ;;  %653 = vmatmul.mubr.msk.f32.gmra.mxu1 %vm64_vm0, %v51_v18  ;;  %v494_v54 = vld [vmem:[#allocation4 + $0x50] sm:$0xff]  ;;  %v493_v55 = vld [vmem:[#allocation4 + $0x48] sm:$0xff]  ;;  %v492_v56 = vld [vmem:[#allocation4 + $0x40] sm:$0xff] }
  0x2f   :  { %177 = vmatprep.mubr.f32.mxu0 %v784_v0  ;;  %290 = vmatprep.mubr.f32.mxu1 %v784_v0  ;;  %v491_v57 = vld [vmem:[#allocation4 + $0x38] sm:$0xff]  ;;  %v490_v58 = vld [vmem:[#allocation4 + $0x30] sm:$0xff]  ;;  %v489_v59 = vld [vmem:[#allocation4 + $0x28] sm:$0xff] }
  0x30   :  { %361 = vmatprep.subr.mxu0 %v348_v19  ;;  %684 = vmatpush3.msra.mxu1 %v499_v49  ;;  %v488_v60 = vld [vmem:[#allocation4 + $0x20] sm:$0xff]  ;;  %v487_v61 = vld [vmem:[#allocation4 + $0x18] sm:$0xff] }
  0x31   :  { %362 = vmatpush1.msra.mxu0 %v347_v20  ;;  %685 = vmatprep.subr.mxu1 %v498_v50 }
  0x32   :  { %646 = vmatmul.mubr.msk.f32.gmra.mxu0 %vm64_vm0, %v52_v21  ;;  %654 = vmatmul.mubr.msk.f32.gmra.mxu1 %vm64_vm0, %v52_v21 }
  0x33   :  { %183 = vmatprep.mubr.f32.mxu0 %v784_v0  ;;  %296 = vmatprep.mubr.f32.mxu1 %v784_v0 }
  0x34   :  { %363 = vmatprep.subr.mxu0 %v346_v22  ;;  %686 = vmatpush3.msra.mxu1 %v498_v50 }
  0x35   :  { %364 = vmatpush1.msra.mxu0 %v345_v23  ;;  %687 = vmatprep.subr.mxu1 %v497_v51 }
  0x36   :  { %647 = vmatmul.mubr.msk.f32.gmra.mxu0 %vm64_vm0, %v53_v24  ;;  %655 = vmatmul.mubr.msk.f32.gmra.mxu1 %vm64_vm0, %v53_v24 }
  0x37   :  { %189 = vmatprep.mubr.f32.mxu0 %v784_v0  ;;  %302 = vmatprep.mubr.f32.mxu1 %v784_v0 }
  0x38   :  { %365 = vmatprep.subr.mxu0 %v344_v25  ;;  %688 = vmatpush3.msra.mxu1 %v497_v51 }
  0x39   :  { %366 = vmatpush1.msra.mxu0 %v343_v26  ;;  %689 = vmatprep.subr.mxu1 %v496_v52 }
  0x3a   :  { %648 = vmatmul.mubr.msk.f32.gmra.mxu0 %vm64_vm0, %v54_v27  ;;  %656 = vmatmul.mubr.msk.f32.gmra.mxu1 %vm64_vm0, %v54_v27 }
  0x3b   :  { %195 = vmatprep.mubr.f32.mxu0 %v784_v0  ;;  %308 = vmatprep.mubr.f32.mxu1 %v784_v0 }
  0x3c   :  { %367 = vmatprep.subr.mxu0 %v342_v28  ;;  %690 = vmatpush3.msra.mxu1 %v496_v52 }
  0x3d   :  { %368 = vmatpush1.msra.mxu0 %v341_v29  ;;  %691 = vmatprep.subr.mxu1 %v495_v53 }
  0x3e   :  { %649 = vmatmul.mubr.msk.f32.gmra.mxu0 %vm64_vm0, %v55_v30  ;;  %657 = vmatmul.mubr.msk.f32.gmra.mxu1 %vm64_vm0, %v55_v30 }
  0x3f   :  { %369 = vmatprep.subr.mxu0 %v340_v31  ;;  %419 = vmatprep.mubr.f32.mxu0 %v784_v0 }
  0x40   :  { %370 = vmatpush1.msra.mxu0 %v339_v32  ;;  %692 = vmatpush3.msra.mxu1 %v495_v53 }
  0x41   :  { %371 = vmatprep.subr.mxu0 %v338_v33  ;;  %693 = vmatprep.subr.mxu1 %v494_v54 }
  0x42   :  { %372 = vmatpush1.msra.mxu0 %v337_v34  ;;  %694 = vmatpush3.msra.mxu1 %v494_v54 }
  0x43   :  { %373 = vmatprep.subr.mxu0 %v336_v35  ;;  %695 = vmatprep.subr.mxu1 %v493_v55 }
  0x44   :  { %374 = vmatpush1.msra.mxu0 %v335_v36  ;;  %696 = vmatpush3.msra.mxu1 %v493_v55 }
  0x45   :  { %375 = vmatprep.subr.mxu0 %v334_v37  ;;  %697 = vmatprep.subr.mxu1 %v492_v56 }
  0x46   :  { %376 = vmatpush1.msra.mxu0 %v333_v38  ;;  %698 = vmatpush3.msra.mxu1 %v492_v56  ;;  %v486_v38 = vld [vmem:[#allocation4 + $0x10] sm:$0xff] }
  0x47   :  { %377 = vmatprep.subr.mxu0 %v332_v39  ;;  %699 = vmatprep.subr.mxu1 %v491_v57  ;;  %v485_v39 = vld [vmem:[#allocation4 + $0x8] sm:$0xff] }
  0x48   :  { %378 = vmatpush1.msra.mxu0 %v331_v40  ;;  %700 = vmatpush3.msra.mxu1 %v491_v57  ;;  %v484_v40 = vld [vmem:[#allocation4] sm:$0xff] }
  0x49   :  { %379 = vmatprep.subr.mxu0 %v330_v41  ;;  %701 = vmatprep.subr.mxu1 %v490_v58 }
  0x4a   :  { %380 = vmatpush1.msra.mxu0 %v329_v42  ;;  %702 = vmatpush3.msra.mxu1 %v490_v58 }
  0x4b   :  { %381 = vmatprep.subr.mxu0 %v328_v43  ;;  %703 = vmatprep.subr.mxu1 %v489_v59 }
  0x4c   :  { %382 = vmatpush1.msra.mxu0 %v327_v44  ;;  %704 = vmatpush3.msra.mxu1 %v489_v59 }
  0x4d   :  { %383 = vmatprep.subr.mxu0 %v326_v45  ;;  %705 = vmatprep.subr.mxu1 %v488_v60 }
  0x4e   :  { %384 = vmatpush1.msra.mxu0 %v325_v46  ;;  %706 = vmatpush3.msra.mxu1 %v488_v60 }
  0x4f   :  { %385 = vmatprep.subr.mxu0 %v324_v47  ;;  %707 = vmatprep.subr.mxu1 %v487_v61 }
  0x50   :  { %386 = vmatpush1.msra.mxu0 %v323_v48  ;;  %708 = vmatpush3.msra.mxu1 %v487_v61 }
  0x51   :  { %709 = vmatprep.subr.mxu1 %v486_v38 }
  0x52   :  { %710 = vmatpush3.msra.mxu1 %v486_v38 }
  0x53   :  { %711 = vmatprep.subr.mxu1 %v485_v39 }
  0x54   :  { %712 = vmatpush3.msra.mxu1 %v485_v39 }
  0x55   :  { %713 = vmatprep.subr.mxu1 %v484_v40 }
  0x56   :  { %714 = vmatpush3.msra.mxu1 %v484_v40 }
  0xe2   :  { %v902_v62 = vpop.f32.mrf.mxu0  ;;  %v268_v63 = vpop.f32.mrf.mxu1 }
  0xe4   :  { %v157_v1 = vpop.f32.mrf.mxu0  ;;  %v270_v2 = vpop.f32.mrf.mxu1 }
  0xe5   :  { %v315_v3 = vmul.f32 %v268_v63, %v157_v1 }
  0xe6   :  { %v904_v4 = vpop.f32.mrf.mxu0  ;;  %v274_v5 = vpop.f32.mrf.mxu1 }
  0xe7   :  { %420 = vmatmul.mubr.f32.vlgmr.msra.gmra.mxu0 %v315_v3 }
  0xe8   :  { %v163_v6 = vpop.f32.mrf.mxu0  ;;  %v276_v7 = vpop.f32.mrf.mxu1  ;;  %425 = vmatprep.mubr.f32.mxu0 %v784_v0 }
  0xe9   :  { %v316_v8 = vmul.f32 %v274_v5, %v163_v6  ;;  %v658_v5 = vld [vmem:[%s964_s4] ss:$0 sm:$0xff] }
  0xea   :  { %v907_v9 = vpop.f32.mrf.mxu0  ;;  %v280_v10 = vpop.f32.mrf.mxu1 }
  0xeb   :  { %426 = vmatmul.mubr.f32.gmra.mxu0 %v316_v8 }
  0xec   :  { %v169_v11 = vpop.f32.mrf.mxu0  ;;  %v282_v12 = vpop.f32.mrf.mxu1  ;;  %431 = vmatprep.mubr.f32.mxu0 %v784_v0 }
  0xed   :  { %v317_v13 = vmul.f32 %v280_v10, %v169_v11 }
  0xee   :  { %v910_v14 = vpop.f32.mrf.mxu0  ;;  %v286_v15 = vpop.f32.mrf.mxu1 }
  0xef   :  { %432 = vmatmul.mubr.f32.gmra.mxu0 %v317_v13 }
  0xf0   :  { %v175_v16 = vpop.f32.mrf.mxu0  ;;  %v288_v17 = vpop.f32.mrf.mxu1  ;;  %437 = vmatprep.mubr.f32.mxu0 %v784_v0 }
  0xf1   :  { %v318_v18 = vmul.f32 %v286_v15, %v175_v16 }
  0xf2   :  { %v913_v19 = vpop.f32.mrf.mxu0  ;;  %v292_v20 = vpop.f32.mrf.mxu1 }
  0xf3   :  { %438 = vmatmul.mubr.f32.gmra.mxu0 %v318_v18 }
  0xf4   :  { %v181_v21 = vpop.f32.mrf.mxu0  ;;  %v294_v22 = vpop.f32.mrf.mxu1  ;;  %443 = vmatprep.mubr.f32.mxu0 %v784_v0 }
  0xf5   :  { %v319_v23 = vmul.f32 %v292_v20, %v181_v21 }
  0xf6   :  { %v916_v24 = vpop.f32.mrf.mxu0  ;;  %v298_v25 = vpop.f32.mrf.mxu1 }
  0xf7   :  { %444 = vmatmul.mubr.f32.gmra.mxu0 %v319_v23 }
  0xf8   :  { %v187_v26 = vpop.f32.mrf.mxu0  ;;  %v300_v27 = vpop.f32.mrf.mxu1  ;;  %449 = vmatprep.mubr.f32.mxu0 %v784_v0 }
  0xf9   :  { %v320_v28 = vmul.f32 %v298_v25, %v187_v26 }
  0xfa   :  { %v919_v29 = vpop.f32.mrf.mxu0  ;;  %v304_v30 = vpop.f32.mrf.mxu1 }
  0xfb   :  { %450 = vmatmul.mubr.f32.gmra.mxu0 %v320_v28 }
  0xfc   :  { %v193_v31 = vpop.f32.mrf.mxu0  ;;  %v306_v32 = vpop.f32.mrf.mxu1  ;;  %455 = vmatprep.mubr.f32.mxu0 %v784_v0 }
  0xfd   :  { %v321_v33 = vmul.f32 %v304_v30, %v193_v31 }
  0xfe   :  { %v922_v34 = vpop.f32.mrf.mxu0  ;;  %v310_v35 = vpop.f32.mrf.mxu1 }
  0xff   :  { %456 = vmatmul.mubr.f32.gmra.mxu0 %v321_v33 }
 0x100   :  { %v199_v36 = vpop.f32.mrf.mxu0  ;;  %461 = vmatprep.mubr.f32.mxu0 %v784_v0  ;;  %v312_v61 = vpop.f32.mrf.mxu1 }
 0x101   :  { %v322_v37 = vmul.f32 %v310_v35, %v199_v36 }
 0x103   :  { %462 = vmatmul.mubr.f32.gmra.mxu0 %v322_v37 }
 0x1a7   :  { %v421_v41 = vpop.f32.mrf.mxu0 }
 0x1a8   :  { %v476_v42 = vmul.f32 %v421_v41, %v270_v2 }
 0x1a9   :  { %v423_v43 = vpop.f32.mrf.mxu0 }
 0x1aa   :  { %715 = vmatprep.mubr.f32.mxu1 %v476_v42  ;;  %v468_v6 = vadd.f32 %v423_v43, %v902_v62 }
 0x1ab   :  { %v427_v44 = vpop.f32.mrf.mxu0 }
 0x1ac   :  { %v477_v45 = vmul.f32 %v427_v44, %v276_v7 }
 0x1ad   :  { %v429_v46 = vpop.f32.mrf.mxu0 }
 0x1ae   :  { %716 = vmatmul.mubr.f32.vlgmr.msra.gmra.mxu1 %v477_v45  ;;  %v469_v2 = vadd.f32 %v429_v46, %v904_v4 }
 0x1af   :  { %v433_v0 = vpop.f32.mrf.mxu0 }
 0x1b0   :  { %v478_v47 = vmul.f32 %v433_v0, %v282_v12 }
 0x1b1   :  { %v435_v48 = vpop.f32.mrf.mxu0 }
 0x1b2   :  { %718 = vmatprep.mubr.f32.mxu1 %v478_v47  ;;  %v470_v15 = vadd.f32 %v435_v48, %v907_v9 }
 0x1b3   :  { %v439_v49 = vpop.f32.mrf.mxu0 }
 0x1b4   :  { %v479_v50 = vmul.f32 %v439_v49, %v288_v17 }
 0x1b5   :  { %v441_v51 = vpop.f32.mrf.mxu0 }
 0x1b6   :  { %719 = vmatmul.mubr.f32.gmra.mxu1 %v479_v50  ;;  %v471_v13 = vadd.f32 %v441_v51, %v910_v14 }
 0x1b7   :  { %v445_v52 = vpop.f32.mrf.mxu0 }
 0x1b8   :  { %v480_v53 = vmul.f32 %v445_v52, %v294_v22 }
 0x1b9   :  { %v447_v54 = vpop.f32.mrf.mxu0 }
 0x1ba   :  { %721 = vmatprep.mubr.f32.mxu1 %v480_v53  ;;  %v472_v22 = vadd.f32 %v447_v54, %v913_v19 }
 0x1bb   :  { %v451_v55 = vpop.f32.mrf.mxu0 }
 0x1bc   :  { %v481_v56 = vmul.f32 %v451_v55, %v300_v27 }
 0x1bd   :  { %v453_v57 = vpop.f32.mrf.mxu0 }
 0x1be   :  { %722 = vmatmul.mubr.f32.gmra.mxu1 %v481_v56  ;;  %v473_v21 = vadd.f32 %v453_v57, %v916_v24 }
 0x1bf   :  { %v457_v58 = vpop.f32.mrf.mxu0 }
 0x1c0   :  { %v482_v59 = vmul.f32 %v457_v58, %v306_v32 }
 0x1c1   :  { %v459_v60 = vpop.f32.mrf.mxu0 }
 0x1c2   :  { %724 = vmatprep.mubr.f32.mxu1 %v482_v59  ;;  %v474_v31 = vadd.f32 %v459_v60, %v919_v29 }
 0x1c3   :  { %v463_v63 = vpop.f32.mrf.mxu0 }
 0x1c4   :  { %v483_v1 = vmul.f32 %v463_v63, %v312_v61 }
 0x1c5   :  { %v465_v27 = vpop.f32.mrf.mxu0 }
 0x1c6   :  { %725 = vmatmul.mubr.f32.gmra.mxu1 %v483_v1  ;;  %v475_v30 = vadd.f32 %v465_v27, %v922_v34 }
 0x26e   :  { %v717_v3 = vpop.f32.mrf.mxu1 }
 0x26f   :  { %v606_v7 = vadd.f32 %v717_v3, %v469_v2 }
 0x270   :  { %v566_v8 = vpop.f32.mrf.mxu1 }
 0x271   :  { %v621_v10 = vadd.f32 %v658_v5, %v606_v7  ;;  %v605_v11 = vadd.f32 %v566_v8, %v468_v6 }
 0x273   :  { %629 = vst [vmem:[%s965_s5 + $0x8] sm:$0xff] %v621_v10  ;;  %v620_v12 = vadd.f32 %v658_v5, %v605_v11 }
 0x275   :  { %628 = vst [vmem:[%s965_s5] sm:$0xff] %v620_v12 }
 0x276   :  { %v720_v4 = vpop.f32.mrf.mxu1 }
 0x277   :  { %v608_v16 = vadd.f32 %v720_v4, %v471_v13 }
 0x278   :  { %v576_v62 = vpop.f32.mrf.mxu1 }
 0x279   :  { %v623_v17 = vadd.f32 %v658_v5, %v608_v16  ;;  %v607_v18 = vadd.f32 %v576_v62, %v470_v15 }
 0x27b   :  { %631 = vst [vmem:[%s965_s5 + $0x18] sm:$0xff] %v623_v17  ;;  %v622_v20 = vadd.f32 %v658_v5, %v607_v18 }
 0x27d   :  { %630 = vst [vmem:[%s965_s5 + $0x10] sm:$0xff] %v622_v20 }
 0x27e   :  { %v723_v14 = vpop.f32.mrf.mxu1 }
 0x27f   :  { %v610_v23 = vadd.f32 %v723_v14, %v473_v21 }
 0x280   :  { %v586_v9 = vpop.f32.mrf.mxu1 }
 0x281   :  { %v625_v25 = vadd.f32 %v658_v5, %v610_v23  ;;  %v609_v26 = vadd.f32 %v586_v9, %v472_v22 }
 0x283   :  { %633 = vst [vmem:[%s965_s5 + $0x28] sm:$0xff] %v625_v25  ;;  %v624_v28 = vadd.f32 %v658_v5, %v609_v26 }
 0x285   :  { %632 = vst [vmem:[%s965_s5 + $0x20] sm:$0xff] %v624_v28 }
 0x286   :  { %v726_v24 = vpop.f32.mrf.mxu1 }
 0x287   :  { %v612_v19 = vadd.f32 %v726_v24, %v475_v30 }
 0x288   :  { %v596_v32 = vpop.f32.mrf.mxu1 }
 0x289   :  { %v627_v33 = vadd.f32 %v658_v5, %v612_v19  ;;  %v611_v35 = vadd.f32 %v596_v32, %v474_v31 }
 0x28b   :  { %635 = vst [vmem:[%s965_s5 + $0x38] sm:$0xff] %v627_v33  ;;  %v626_v36 = vadd.f32 %v658_v5, %v611_v35 }
 0x28d   :  { %634 = vst [vmem:[%s965_s5 + $0x30] sm:$0xff] %v626_v36 }
 0x28e   :  { %640 = vsyncpa [#allocation3], 1 }
 0x28f   :  { %641 = vsyncpa [#allocation5], 1 }

</bundles_post_ra>
